<compile_context>
chip_gen: v5e
topology: v5e:2x2
jax: 0.10.0
libtpu: 0.0.40
codegen_flags: <defaults>
</compile_context>

<pallas_src>
import functools

import jax
import jax.numpy as jnp
from jax.experimental import pallas as pl
from jax.experimental.pallas import tpu as pltpu

BN_EPS = 1e-5

# Model geometry (input_size=10 is required so flatten after pool2 is exactly 64).
L = 10            # input sequence length
L1 = L - 2        # conv1 output length (8)
P1 = L1 // 2      # pool1 output length (4)
L2 = P1 - 2       # conv2 output length (2)

XA_W = 17         # data slab lanes: x[0:10] | zeros[10:15] | 1.0[15] | a[16]
VEC_R, VEC_W = 16, 256
W_R, W_W = 336, 256


# --------------------------------------------------------------------------
# Pallas kernel: whole forward pass for one batch tile.
# Inputs: data slab (TB, 17) f32, vector slab (16, 256) f32, weight slab
# (336, 256) bf16.  Output: lane-dense (TB, 128) f32.
# --------------------------------------------------------------------------
def paired_cnn_kernel(xa_ref, vec_ref, w_ref, out_ref):
    xa = xa_ref[...]                                 # (TB, 17)
    x16 = xa[:, 0:16].astype(jnp.bfloat16)           # padded x; lane 15 == 1.0 (bias)
    a = xa[:, 16:17]                                 # (TB, 1) raw gene id (concat uses raw a)

    V = vec_ref[...]                                 # (16, 256) f32
    s1, t1 = V[0:1, :], V[1:2, :]                    # BN1 scale/shift, 256 lanes (even|odd)
    b2, s2, t2 = V[2:3, 0:128], V[3:4, 0:128], V[4:5, 0:128]
    bf1, s3, t3 = V[5:6, 0:128], V[6:7, 0:128], V[7:8, 0:128]
    bf2, wf2a = V[8:9, 0:128], V[9:10, 0:128]        # fc2 bias / fc2 'a' column (lane-padded)

    w1 = w_ref[0:16, :]                              # (16, 256) conv1 fused band, row 15 = bias
    w2 = w_ref[16:144, 0:128]                        # (128, 128) conv2 band
    wf1 = w_ref[144:208, 0:128]                      # (64, 128)  fc1
    wf2x = w_ref[208:336, 0:128]                     # (128, 128) fc2 x-part (lane-padded)

    # ---- conv1 (+bias folded into band row 15), ReLU, BN1; pool1 = max(even, odd)
    h1 = jnp.dot(x16, w1, preferred_element_type=jnp.float32)    # (TB, 256)
    h1 = jnp.maximum(h1, 0.0) * s1 + t1
    p1 = jnp.maximum(h1[:, 0:128], h1[:, 128:256])                # (TB, 128) [u*32 + c]
    # TODO(synk): dropout1/2/3 are identity in inference mode.

    # ---- conv2 (+bias, ReLU, BN2) as one banded matmul
    h2 = jnp.dot(p1.astype(jnp.bfloat16), w2,
                 preferred_element_type=jnp.float32) + b2
    h2 = jnp.maximum(h2, 0.0) * s2 + t2                           # (TB, 128) [t*64 + c]

    # ---- pool2 + flatten -> (TB, 64)
    p2 = jnp.maximum(h2[:, 0:64], h2[:, 64:128])

    # ---- fc1 + ReLU + BN3
    f1 = jnp.dot(p2.astype(jnp.bfloat16), wf1,
                 preferred_element_type=jnp.float32) + bf1
    f1 = jnp.maximum(f1, 0.0) * s3 + t3

    # ---- fc2 on cat([f1, a]); 'a' column is a rank-1 update; lane-dense output
    out_ref[...] = (jnp.dot(f1.astype(jnp.bfloat16), wf2x,
                            preferred_element_type=jnp.float32)
                    + a * wf2a + bf2)


# --------------------------------------------------------------------------
# Host-side slab construction: BN folding + band packing.  Called ONCE per
# parameter set (not per forward call).
# --------------------------------------------------------------------------
def _bn_fold(g, b, m, v):
    scale = g / jnp.sqrt(v + BN_EPS)
    shift = b - m * scale
    return scale, shift


def build_slabs(params):
    f32 = jnp.float32
    s1, t1 = _bn_fold(params["bn1_g"], params["bn1_b"], params["bn1_m"], params["bn1_v"])
    s2, t2 = _bn_fold(params["bn2_g"], params["bn2_b"], params["bn2_m"], params["bn2_v"])
    s3, t3 = _bn_fold(params["bn3_g"], params["bn3_b"], params["bn3_m"], params["bn3_v"])
    wf2 = params["fc2_w"].T.astype(f32)                       # (129, 5)

    # --- vector slab (16, 256) f32 ---
    V = jnp.zeros((VEC_R, VEC_W), f32)
    V = V.at[0].set(jnp.tile(s1, 2 * P1))                     # BN1 scale, even|odd halves
    V = V.at[1].set(jnp.tile(t1, 2 * P1))                     # BN1 shift
    V = V.at[2, 0:128].set(jnp.tile(params["conv2_b"], L2))
    V = V.at[3, 0:128].set(jnp.tile(s2, L2))
    V = V.at[4, 0:128].set(jnp.tile(t2, L2))
    V = V.at[5, 0:128].set(params["fc1_b"])
    V = V.at[6, 0:128].set(s3)
    V = V.at[7, 0:128].set(t3)
    V = V.at[8, 0:5].set(params["fc2_b"])
    V = V.at[9, 0:5].set(wf2[128])                            # fc2 weights for 'a'

    # --- weight slab (336, 256), built in f32, stored as bf16 ---
    w1k = jnp.transpose(params["conv1_w"][:, 0, :])           # (3, 32)  [k, c]
    w2k = jnp.transpose(params["conv2_w"], (2, 1, 0))         # (3, 32, 64) [k, cin, cout]
    W = jnp.zeros((W_R, W_W), f32)
    # conv1 fused band (rows 0..15): even outputs in lanes 0:128, odd in 128:256.
    #   even: W[2u+k,       u*32+c] = w1[k, c]
    #   odd : W[2u+1+k, 128+u*32+c] = w1[k, c]
    for u in range(P1):
        for k in range(3):
            W = W.at[2 * u + k, u * 32:(u + 1) * 32].set(w1k[k])
            W = W.at[2 * u + 1 + k, 128 + u * 32:128 + (u + 1) * 32].set(w1k[k])
    # conv1 bias folded into band row 15 (x column 15 carries 1.0)
    W = W.at[15, 0:128].set(jnp.tile(params["conv1_b"], P1))
    W = W.at[15, 128:256].set(jnp.tile(params["conv1_b"], P1))
    # conv2 band (rows 16..143): W[16+(t+k)*32+cin, t*64+cout] = w2[k, cin, cout]
    for t in range(L2):
        for k in range(3):
            u = t + k
            W = W.at[16 + u * 32:16 + (u + 1) * 32, t * 64:(t + 1) * 64].set(w2k[k])
    # fc1 (rows 144..207)
    W = W.at[144:208, 0:128].set(params["fc1_w"].T)
    # fc2 x-part (rows 208..335), only first 5 output lanes are live
    W = W.at[208:336, 0:5].set(wf2[0:128])
    return V, W.astype(jnp.bfloat16)


# --------------------------------------------------------------------------
# Jitted forward: takes precomputed slabs, packs the data slab, runs the
# batch-gridded pallas_call.
# --------------------------------------------------------------------------
@functools.partial(jax.jit, static_argnames=("tb",))
def paired_cnn_forward(x, a, V, W, tb=256):
    """x: (B, input_size, 1) float32; a: (B, 1, 1) float32 with integer gene ids."""
    B = x.shape[0]
    xs = x[..., 0]                            # == permute(0,2,1) with Cin=1 -> (B, L)
    a2 = a[..., 0]                            # == a.squeeze(-1) -> (B, 1)
    Lk = xs.shape[1]

    # Data slab: x | zero pad | 1.0 (bias lane) | a
    xa = jnp.zeros((B, XA_W), jnp.float32)
    xa = xa.at[:, 0:Lk].set(xs)
    xa = xa.at[:, 15].set(1.0)
    xa = xa.at[:, 16:17].set(a2)

    # Batch tile: multiple of 8 for sublane alignment, capped to limit vreg pressure.
    TB = min(tb, max(8, ((B + 7) // 8) * 8))
    Bp = ((B + TB - 1) // TB) * TB
    if Bp != B:
        xa = jnp.pad(xa, ((0, Bp - B), (0, 0)))

    out = pl.pallas_call(
        paired_cnn_kernel,
        out_shape=jax.ShapeDtypeStruct((Bp, 128), jnp.float32),
        grid_spec=pltpu.PrefetchScalarGridSpec(
            num_scalar_prefetch=0,
            grid=(Bp // TB,),
            in_specs=[
                pl.BlockSpec((TB, XA_W), lambda i: (i, 0)),
                pl.BlockSpec((VEC_R, VEC_W), lambda i: (0, 0)),   # VMEM-resident
                pl.BlockSpec((W_R, W_W), lambda i: (0, 0)),       # VMEM-resident
            ],
            out_specs=pl.BlockSpec((TB, 128), lambda i: (i, 0)),
        ),
        compiler_params=pltpu.CompilerParams(
            dimension_semantics=("parallel",)),
        cost_estimate=pl.CostEstimate(
            flops=2 * Bp * (16 * 256 + 128 * 128 + 64 * 128 + 128 * 128),
            transcendentals=0,
            bytes_accessed=Bp * XA_W * 4 + VEC_R * VEC_W * 4
                           + W_R * W_W * 2 + Bp * 128 * 4),
    )(xa, V, W)
    # Note: relu(embedding(a)) in the PyTorch forward is dead code (discarded),
    # so it is intentionally not computed.
    return out[:B, :5]


# --------------------------------------------------------------------------
# Deterministic parameter init (shapes from PairedCNNModel.__init__).
# --------------------------------------------------------------------------
def init_params(key, hidden=128, num_genes=5):
    ks = jax.random.split(key, 24)
    r = lambda k, s, sc=0.1: sc * jax.random.normal(k, s, jnp.float32)
    u = lambda k, s: 0.5 + 0.5 * jax.random.uniform(k, s, jnp.float32)
    return {
        "conv1_w": r(ks[0], (32, 1, 3)),  "conv1_b": r(ks[1], (32,)),
        "bn1_g": 1.0 + r(ks[2], (32,)),   "bn1_b": r(ks[3], (32,)),
        "bn1_m": r(ks[4], (32,)),         "bn1_v": u(ks[5], (32,)),
        "conv2_w": r(ks[6], (64, 32, 3)), "conv2_b": r(ks[7], (64,)),
        "bn2_g": 1.0 + r(ks[8], (64,)),   "bn2_b": r(ks[9], (64,)),
        "bn2_m": r(ks[10], (64,)),        "bn2_v": u(ks[11], (64,)),
        "fc1_w": r(ks[12], (hidden, 64)), "fc1_b": r(ks[13], (hidden,)),
        "bn3_g": 1.0 + r(ks[14], (hidden,)), "bn3_b": r(ks[15], (hidden,)),
        "bn3_m": r(ks[16], (hidden,)),    "bn3_v": u(ks[17], (hidden,)),
        "embedding": r(ks[18], (num_genes, hidden)),
        "fc2_w": r(ks[19], (5, hidden + 1)), "fc2_b": r(ks[20], (5,)),
        # fc_gene / batch_norm_gene exist in __init__ but are unused in forward.
    }


# --------------------------------------------------------------------------
# Pure-JAX reference (mirrors PyTorch forward in NCL layout) for validation.
# --------------------------------------------------------------------------
def reference_forward(x, a, p):
    xp = jnp.transpose(x, (0, 2, 1))                                  # (B,1,L)

    def conv1d(z, w, b):
        y = jax.lax.conv_general_dilated(
            z, w, window_strides=(1,), padding="VALID",
            dimension_numbers=("NCH", "OIH", "NCH"))
        return y + b[None, :, None]

    def bn3d(z, g, b, m, v):
        return (z - m[None, :, None]) / jnp.sqrt(v[None, :, None] + BN_EPS) \
               * g[None, :, None] + b[None, :, None]

    def bn2d(z, g, b, m, v):
        return (z - m[None, :]) / jnp.sqrt(v[None, :] + BN_EPS) * g[None, :] + b[None, :]

    def pool(z):
        B, C, Lz = z.shape
        return z.reshape(B, C, Lz // 2, 2).max(axis=-1)

    h = jnp.maximum(conv1d(xp, p["conv1_w"], p["conv1_b"]), 0.0)
    h = bn3d(h, p["bn1_g"], p["bn1_b"], p["bn1_m"], p["bn1_v"])
    h = pool(h)
    h = jnp.maximum(conv1d(h, p["conv2_w"], p["conv2_b"]), 0.0)
    h = bn3d(h, p["bn2_g"], p["bn2_b"], p["bn2_m"], p["bn2_v"])
    h = pool(h)
    h = h.reshape(h.shape[0], -1)                                     # (B, 64)
    h = jnp.maximum(h @ p["fc1_w"].T + p["fc1_b"], 0.0)
    h = bn2d(h, p["bn3_g"], p["bn3_b"], p["bn3_m"], p["bn3_v"])
    a2 = a[..., 0]                                                    # (B, 1)
    z = jnp.concatenate([h, a2], axis=1)                              # (B, hidden+1)
    out = z @ p["fc2_w"].T + p["fc2_b"]
    return out.reshape(out.shape[0], -1)


if __name__ == "__main__":
    B = 8             # input_size=10 so flatten after pool2 yields exactly 64 features
    key = jax.random.PRNGKey(0)
    kx, ka, kp = jax.random.split(key, 3)

    x = jax.random.normal(kx, (B, L, 1), jnp.float32)
    gene_ids = jax.random.randint(ka, (B, 1, 1), 0, 5)
    a = gene_ids.astype(jnp.float32)
    params = init_params(kp)

    # Slabs are built once per parameter set, outside the per-call path.
    V, W = build_slabs(params)
    V = jax.block_until_ready(V)
    W = jax.block_until_ready(W)

    out = paired_cnn_forward(x, a, V, W)
    out = jax.block_until_ready(out)

    ref = reference_forward(x, a, params)
    assert out.shape == (B, 5), out.shape
    assert bool(jnp.all(jnp.isfinite(out)))
    assert bool(jnp.allclose(out, ref, rtol=2e-2, atol=2e-2)), (out, ref)

    print("KERNEL_OK")
</pallas_src>

<mosaic_0001>
module attributes {stable_mosaic.version = 11 : i64} {
  func.func @paired_cnn_kernel(%arg0: i32, %arg1: memref<8x17xf32, #tpu.memory_space<vmem>>, %arg2: memref<16x256xf32, #tpu.memory_space<vmem>>, %arg3: memref<336x256xbf16, #tpu.memory_space<vmem>>, %arg4: memref<8x128xf32, #tpu.memory_space<vmem>>) attributes {dimension_semantics = [#tpu.dimension_semantics<parallel>], iteration_bounds = array<i64: 1>, scalar_prefetch = 0 : i64, scratch_operands = 0 : i64, tpu.core_type = #tpu.core_type<tc>, window_params = [{transform_indices = @transform_0, window_bounds = array<i64: 8, 17>}, {pipeline_mode = #tpu.pipeline_mode<synchronous>, transform_indices = @transform_1, window_bounds = array<i64: 16, 256>}, {pipeline_mode = #tpu.pipeline_mode<synchronous>, transform_indices = @transform_2, window_bounds = array<i64: 336, 256>}, {transform_indices = @transform_3, window_bounds = array<i64: 8, 128>}]} {
    %c0 = arith.constant 0 : index
    %c0_0 = arith.constant 0 : index
    %0 = vector.load %arg1[%c0, %c0_0] : memref<8x17xf32, #tpu.memory_space<vmem>>, vector<8x17xf32>
    %1 = vector.extract_strided_slice %0 {offsets = [0, 0], sizes = [8, 16], strides = [1, 1]} : vector<8x17xf32> to vector<8x16xf32>
    %2 = arith.truncf %1 : vector<8x16xf32> to vector<8x16xbf16>
    %3 = vector.extract_strided_slice %0 {offsets = [0, 16], sizes = [8, 1], strides = [1, 1]} : vector<8x17xf32> to vector<8x1xf32>
    %c0_1 = arith.constant 0 : index
    %c0_2 = arith.constant 0 : index
    %4 = vector.load %arg2[%c0_1, %c0_2] : memref<16x256xf32, #tpu.memory_space<vmem>>, vector<16x256xf32>
    %5 = vector.extract_strided_slice %4 {offsets = [0, 0], sizes = [1, 256], strides = [1, 1]} : vector<16x256xf32> to vector<1x256xf32>
    %6 = vector.extract_strided_slice %4 {offsets = [1, 0], sizes = [1, 256], strides = [1, 1]} : vector<16x256xf32> to vector<1x256xf32>
    %7 = vector.extract_strided_slice %4 {offsets = [2, 0], sizes = [1, 128], strides = [1, 1]} : vector<16x256xf32> to vector<1x128xf32>
    %8 = vector.extract_strided_slice %4 {offsets = [3, 0], sizes = [1, 128], strides = [1, 1]} : vector<16x256xf32> to vector<1x128xf32>
    %9 = vector.extract_strided_slice %4 {offsets = [4, 0], sizes = [1, 128], strides = [1, 1]} : vector<16x256xf32> to vector<1x128xf32>
    %10 = vector.extract_strided_slice %4 {offsets = [5, 0], sizes = [1, 128], strides = [1, 1]} : vector<16x256xf32> to vector<1x128xf32>
    %11 = vector.extract_strided_slice %4 {offsets = [6, 0], sizes = [1, 128], strides = [1, 1]} : vector<16x256xf32> to vector<1x128xf32>
    %12 = vector.extract_strided_slice %4 {offsets = [7, 0], sizes = [1, 128], strides = [1, 1]} : vector<16x256xf32> to vector<1x128xf32>
    %13 = vector.extract_strided_slice %4 {offsets = [8, 0], sizes = [1, 128], strides = [1, 1]} : vector<16x256xf32> to vector<1x128xf32>
    %14 = vector.extract_strided_slice %4 {offsets = [9, 0], sizes = [1, 128], strides = [1, 1]} : vector<16x256xf32> to vector<1x128xf32>
    %c0_3 = arith.constant 0 : index
    %c0_4 = arith.constant 0 : index
    %15 = vector.load %arg3[%c0_3, %c0_4] : memref<336x256xbf16, #tpu.memory_space<vmem>>, vector<16x256xbf16>
    %c16 = arith.constant 16 : index
    %c0_5 = arith.constant 0 : index
    %16 = vector.load %arg3[%c16, %c0_5] : memref<336x256xbf16, #tpu.memory_space<vmem>>, vector<128x128xbf16>
    %c144 = arith.constant 144 : index
    %c0_6 = arith.constant 0 : index
    %17 = vector.load %arg3[%c144, %c0_6] : memref<336x256xbf16, #tpu.memory_space<vmem>>, vector<64x128xbf16>
    %c208 = arith.constant 208 : index
    %c0_7 = arith.constant 0 : index
    %18 = vector.load %arg3[%c208, %c0_7] : memref<336x256xbf16, #tpu.memory_space<vmem>>, vector<128x128xbf16>
    %cst = arith.constant dense<0.000000e+00> : vector<8x256xf32>
    %19 = tpu.matmul %2, %15, %cst {dimension_numbers = #tpu.dot_dimension_numbers<[1], [0], [0], [1], [0, 0, 1, 1], [], []>} : vector<8x16xbf16>, vector<16x256xbf16>, vector<8x256xf32> -> vector<8x256xf32>
    %cst_8 = arith.constant 0.000000e+00 : f32
    %20 = vector.broadcast %cst_8 : f32 to vector<8x256xf32>
    %21 = arith.maximumf %19, %20 : vector<8x256xf32>
    %22 = vector.broadcast %5 : vector<1x256xf32> to vector<8x256xf32>
    %23 = arith.mulf %21, %22 : vector<8x256xf32>
    %24 = vector.broadcast %6 : vector<1x256xf32> to vector<8x256xf32>
    %25 = arith.addf %23, %24 : vector<8x256xf32>
    %26 = vector.extract_strided_slice %25 {offsets = [0, 0], sizes = [8, 128], strides = [1, 1]} : vector<8x256xf32> to vector<8x128xf32>
    %27 = vector.extract_strided_slice %25 {offsets = [0, 128], sizes = [8, 128], strides = [1, 1]} : vector<8x256xf32> to vector<8x128xf32>
    %28 = arith.maximumf %26, %27 : vector<8x128xf32>
    %29 = arith.truncf %28 : vector<8x128xf32> to vector<8x128xbf16>
    %cst_9 = arith.constant dense<0.000000e+00> : vector<8x128xf32>
    %30 = tpu.matmul %29, %16, %cst_9 {dimension_numbers = #tpu.dot_dimension_numbers<[1], [0], [0], [1], [0, 0, 1, 1], [], []>} : vector<8x128xbf16>, vector<128x128xbf16>, vector<8x128xf32> -> vector<8x128xf32>
    %31 = vector.broadcast %7 : vector<1x128xf32> to vector<8x128xf32>
    %32 = arith.addf %30, %31 : vector<8x128xf32>
    %cst_10 = arith.constant 0.000000e+00 : f32
    %33 = vector.broadcast %cst_10 : f32 to vector<8x128xf32>
    %34 = arith.maximumf %32, %33 : vector<8x128xf32>
    %35 = vector.broadcast %8 : vector<1x128xf32> to vector<8x128xf32>
    %36 = arith.mulf %34, %35 : vector<8x128xf32>
    %37 = vector.broadcast %9 : vector<1x128xf32> to vector<8x128xf32>
    %38 = arith.addf %36, %37 : vector<8x128xf32>
    %39 = vector.extract_strided_slice %38 {offsets = [0, 0], sizes = [8, 64], strides = [1, 1]} : vector<8x128xf32> to vector<8x64xf32>
    %40 = vector.extract_strided_slice %38 {offsets = [0, 64], sizes = [8, 64], strides = [1, 1]} : vector<8x128xf32> to vector<8x64xf32>
    %41 = arith.maximumf %39, %40 : vector<8x64xf32>
    %42 = arith.truncf %41 : vector<8x64xf32> to vector<8x64xbf16>
    %cst_11 = arith.constant dense<0.000000e+00> : vector<8x128xf32>
    %43 = tpu.matmul %42, %17, %cst_11 {dimension_numbers = #tpu.dot_dimension_numbers<[1], [0], [0], [1], [0, 0, 1, 1], [], []>} : vector<8x64xbf16>, vector<64x128xbf16>, vector<8x128xf32> -> vector<8x128xf32>
    %44 = vector.broadcast %10 : vector<1x128xf32> to vector<8x128xf32>
    %45 = arith.addf %43, %44 : vector<8x128xf32>
    %cst_12 = arith.constant 0.000000e+00 : f32
    %46 = vector.broadcast %cst_12 : f32 to vector<8x128xf32>
    %47 = arith.maximumf %45, %46 : vector<8x128xf32>
    %48 = vector.broadcast %11 : vector<1x128xf32> to vector<8x128xf32>
    %49 = arith.mulf %47, %48 : vector<8x128xf32>
    %50 = vector.broadcast %12 : vector<1x128xf32> to vector<8x128xf32>
    %51 = arith.addf %49, %50 : vector<8x128xf32>
    %52 = arith.truncf %51 : vector<8x128xf32> to vector<8x128xbf16>
    %cst_13 = arith.constant dense<0.000000e+00> : vector<8x128xf32>
    %53 = tpu.matmul %52, %18, %cst_13 {dimension_numbers = #tpu.dot_dimension_numbers<[1], [0], [0], [1], [0, 0, 1, 1], [], []>} : vector<8x128xbf16>, vector<128x128xbf16>, vector<8x128xf32> -> vector<8x128xf32>
    %54 = vector.broadcast %3 : vector<8x1xf32> to vector<8x128xf32>
    %55 = vector.broadcast %14 : vector<1x128xf32> to vector<8x128xf32>
    %56 = arith.mulf %54, %55 : vector<8x128xf32>
    %57 = arith.addf %53, %56 : vector<8x128xf32>
    %58 = vector.broadcast %13 : vector<1x128xf32> to vector<8x128xf32>
    %59 = arith.addf %57, %58 : vector<8x128xf32>
    %c0_14 = arith.constant 0 : index
    %c0_15 = arith.constant 0 : index
    %60 = vector.load %arg4[%c0_14, %c0_15] : memref<8x128xf32, #tpu.memory_space<vmem>>, vector<8x128xf32>
    tpu.vector_store %arg4[%c0_14, %c0_15], %59 {strides = array<i32>} : memref<8x128xf32, #tpu.memory_space<vmem>>, vector<8x128xf32>,
    return
  }
  func.func @transform_0(%arg0: i32) -> (i32, i32) {
    %c0_i32 = arith.constant 0 : i32
    %c0_i32_0 = arith.constant 0 : i32
    return %arg0, %c0_i32 : i32, i32
  }
  func.func @transform_1(%arg0: i32) -> (i32, i32) {
    %c0_i32 = arith.constant 0 : i32
    %c0_i32_0 = arith.constant 0 : i32
    %c0_i32_1 = arith.constant 0 : i32
    return %c0_i32, %c0_i32_0 : i32, i32
  }
  func.func @transform_2(%arg0: i32) -> (i32, i32) {
    %c0_i32 = arith.constant 0 : i32
    %c0_i32_0 = arith.constant 0 : i32
    %c0_i32_1 = arith.constant 0 : i32
    return %c0_i32, %c0_i32_0 : i32, i32
  }
  func.func @transform_3(%arg0: i32) -> (i32, i32) {
    %c0_i32 = arith.constant 0 : i32
    %c0_i32_0 = arith.constant 0 : i32
    return %arg0, %c0_i32 : i32, i32
  }
}

</mosaic_0001>

<bundles_post_ra>
// kernel: paired_cnn_forward.1
= control target key start
LH: loop header
LB: loop body
LE: loop exit
PB: predicated region body
PF: predicated region fallthrough
CT: control target
= control target key end

     0   :  { %8 = vsyncpa [#allocation3], 0  ;;  %s571_s0 = inlined_call_operand.vmem [shape: f32[8,17], index: 0, kind: input, shape index: {}]   ;;  %s572_s1 = inlined_call_operand.vmem [shape: f32[16,256], index: 1, kind: input, shape index: {}]   ;;  %s573_s2 = inlined_call_operand.hbm [shape: bf16[336,256], index: 2, kind: input, shape index: {}]   ;;  %s574_s3 = inlined_call_operand.hbm [shape: f32[8,128], index: 3, kind: output, shape index: {}]  }
   0x1   :  { %9 = vsyncpa [#allocation4], 0  ;;  %s18_s14 = sshll.u32 %s573_s2, 4  ;;  %s512_s15 = smov [#allocation2]   ;;  %s19_s14 = int_to_ptr.hbm [resolvable:$true] %s18_s14 }
   0x2   :  { %s20_s16 = sshll.u32 %s512_s15, 4  ;;  %s513_s17 = smov 128   ;;  %s21_s16 = int_to_ptr.vmem [resolvable:$true] %s20_s16 }
   0x3   :  { %s514_s18 = smov 8  }
   0x4   :  { %26 = dma.hbm_to_vmem [thread:$0]  %s19_s14, 5376, %s21_s16, [#allocation3], %s513_s17, %s513_s17, %s514_s18  }
   0x5   :  { %508 = dma.done.wait [#allocation3], 5376  }
   0x6   :  { %509 = vsyncadd [#allocation3], 4294961920  ;;  %v342_v0 = vld [vmem:[#allocation2] sm:$0xf]  ;;  %v432_v1 = vld [vmem:[#allocation2 + $0x4] sm:$0xf0] }
   0x7   :  { %v544_v2 = vld [vmem:[%s571_s0] sm:$0xff]  ;;  %v343_v3 = vor.u32 %v432_v1, %v342_v0  ;;  %v344_v5 = vld [vmem:[#allocation2 + $0x8] sm:$0xf0]  ;;  %v440_v9 = vld [vmem:[#allocation2 + $0x84] sm:$0xf0]  ;;  %vm89_vm0 = vcmask 130048  }
   0x8   :  { %v431_v4 = vld [vmem:[#allocation2 + $0x4] sm:$0xf]  ;;  %v380_v6 = vld [vmem:[#allocation2 + $0x80] sm:$0xf]  ;;  %v33_v7 = vpack.c.bf16 %v544_v2, %v544_v2  ;;  %v376_v11 = vld [vmem:[#allocation2 + $0x70] sm:$0xf] }
   0x9   :  { %v347_v8 = vor.u32 %v431_v4, %v344_v5  ;;  %100 = vmatpush.bf16.msra.mxu1 %v343_v3  ;;  %v381_v10 = vor.u32 %v440_v9, %v380_v6  ;;  %v439_v12 = vld [vmem:[#allocation2 + $0x74] sm:$0xf0]  ;;  %v372_v14 = vld [vmem:[#allocation2 + $0x60] sm:$0xf]  ;;  %v438_v15 = vld [vmem:[#allocation2 + $0x64] sm:$0xf0] }
   0xa   :  { %v377_v13 = vor.u32 %v439_v12, %v376_v11  ;;  %v373_v16 = vor.u32 %v438_v15, %v372_v14  ;;  %v368_v17 = vld [vmem:[#allocation2 + $0x50] sm:$0xf]  ;;  %v437_v18 = vld [vmem:[#allocation2 + $0x54] sm:$0xf0]  ;;  %v364_v20 = vld [vmem:[#allocation2 + $0x40] sm:$0xf] }
   0xb   :  { %180 = vmatpush.bf16.msra.mxu2 %v381_v10  ;;  %v369_v19 = vor.u32 %v437_v18, %v368_v17  ;;  %v436_v21 = vld [vmem:[#allocation2 + $0x44] sm:$0xf0]  ;;  %v360_v23 = vld [vmem:[#allocation2 + $0x30] sm:$0xf]  ;;  %v435_v24 = vld [vmem:[#allocation2 + $0x34] sm:$0xf0] }
   0xc   :  { %348 = vmatmul.msk.bf16.vlgmr.msra.gmra.mxu1 %vm89_vm0, %v33_v7  ;;  %v365_v22 = vor.u32 %v436_v21, %v364_v20  ;;  %v361_v25 = vor.u32 %v435_v24, %v360_v23  ;;  %v356_v26 = vld [vmem:[#allocation2 + $0x20] sm:$0xf]  ;;  %v434_v27 = vld [vmem:[#allocation2 + $0x24] sm:$0xf0]  ;;  %v352_v29 = vld [vmem:[#allocation2 + $0x10] sm:$0xf] }
   0xd   :  { %113 = vmatpush.bf16.msrb.mxu1 %v347_v8  ;;  %v357_v28 = vor.u32 %v434_v27, %v356_v26  ;;  %v433_v30 = vld [vmem:[#allocation2 + $0x14] sm:$0xf0]  ;;  %v551_v34 = vld [vmem:[%s572_s1] sm:$0xff]  ;;  %v35_v35 = vld [vmem:[%s572_s1 + $0x8] sm:$0xff]  ;;  %s515_s23 = smov 64   ;;  %vm229_vm1 = vcmask 523264  }
   0xe   :  { %v353_v31 = vor.u32 %v433_v30, %v352_v29  ;;  %v121_v37 = vperm.slane %v551_v34, 0  ;;  %v122_v38 = vperm.slane %v35_v35, 0  ;;  %v125_v42 = vperm.slane %v551_v34, 1  ;;  %v396_v50 = vld [vmem:[#allocation2 + $0xc0] sm:$0xf]  ;;  %s517_s26 = smov [#allocation5]  }
   0xf   :  { %181 = vmatpush.bf16.msra.mxu2 %v377_v13  ;;  %v126_v43 = vperm.slane %v35_v35, 1  ;;  %v444_v51 = vld [vmem:[#allocation2 + $0xc4] sm:$0xf0]  ;;  %v392_v52 = vld [vmem:[#allocation2 + $0xb0] sm:$0xf]  ;;  %v131_v59 = vperm.slane %v551_v34, 2 }
  0x10   :  { %v397_v53 = vor.u32 %v444_v51, %v396_v50  ;;  %v443_v54 = vld [vmem:[#allocation2 + $0xb4] sm:$0xf0]  ;;  %v388_v56 = vld [vmem:[#allocation2 + $0xa0] sm:$0xf]  ;;  %v442_v57 = vld [vmem:[#allocation2 + $0xa4] sm:$0xf0] }
  0x11   :  { %v393_v55 = vor.u32 %v443_v54, %v392_v52  ;;  %v389_v58 = vor.u32 %v442_v57, %v388_v56  ;;  %v194_v62 = vperm.slane %v551_v34, 3  ;;  %v196_v0 = vperm.slane %v551_v34, 4  ;;  %v384_v5 = vld [vmem:[#allocation2 + $0x90] sm:$0xf]  ;;  %v441_v6 = vld [vmem:[#allocation2 + $0x94] sm:$0xf0] }
  0x12   :  { %237 = vmatpush.bf16.msra.mxu3 %v397_v53  ;;  %v429_v8 = vld [vmem:[#allocation2 + $0x140] sm:$0xf]  ;;  %v452_v9 = vld [vmem:[#allocation2 + $0x144] sm:$0xf0]  ;;  %v425_v10 = vld [vmem:[#allocation2 + $0x130] sm:$0xf] }
  0x13   :  { %182 = vmatpush.bf16.msra.mxu2 %v373_v16  ;;  %v430_v11 = vor.u32 %v452_v9, %v429_v8  ;;  %v451_v12 = vld [vmem:[#allocation2 + $0x134] sm:$0xf0]  ;;  %v421_v14 = vld [vmem:[#allocation2 + $0x120] sm:$0xf]  ;;  %v450_v15 = vld [vmem:[#allocation2 + $0x124] sm:$0xf0] }
  0x14   :  { %v426_v13 = vor.u32 %v451_v12, %v425_v10  ;;  %v422_v16 = vor.u32 %v450_v15, %v421_v14  ;;  %v417_v17 = vld [vmem:[#allocation2 + $0x110] sm:$0xf]  ;;  %v449_v18 = vld [vmem:[#allocation2 + $0x114] sm:$0xf0]  ;;  %v413_v20 = vld [vmem:[#allocation2 + $0x100] sm:$0xf] }
  0x15   :  { %307 = vmatpush.bf16.msra.mxu0 %v430_v11  ;;  %v448_v21 = vld [vmem:[#allocation2 + $0x104] sm:$0xf0]  ;;  %v409_v26 = vld [vmem:[#allocation2 + $0xf0] sm:$0xf]  ;;  %v447_v27 = vld [vmem:[#allocation2 + $0xf4] sm:$0xf0] }
  0x16   :  { %238 = vmatpush.bf16.msra.mxu3 %v393_v55  ;;  %v405_v29 = vld [vmem:[#allocation2 + $0xe0] sm:$0xf]  ;;  %v446_v30 = vld [vmem:[#allocation2 + $0xe4] sm:$0xf0]  ;;  %s328_s27 = sshll.u32 %s517_s26, 4  ;;  %s330_s30 = sshll.u32 %s574_s3, 4  ;;  %s329_s27 = int_to_ptr.vmem [resolvable:$true] %s328_s27  ;;  %s331_s30 = int_to_ptr.hbm [resolvable:$true] %s330_s30 }
  0x17   :  { %183 = vmatpush.bf16.msra.mxu2 %v369_v19  ;;  %v418_v19 = vor.u32 %v449_v18, %v417_v17 }
  0x19   :  { %308 = vmatpush.bf16.msra.mxu0 %v426_v13 }
  0x1a   :  { %239 = vmatpush.bf16.msra.mxu3 %v389_v58 }
  0x1b   :  { %184 = vmatpush.bf16.msra.mxu2 %v365_v22  ;;  %v414_v22 = vor.u32 %v448_v21, %v413_v20 }
  0x1c   :  { %349 = vmatmul.msk.bf16.vlgmr.msrb.gmra.mxu1 %vm89_vm0, %v33_v7  ;;  %v385_v7 = vor.u32 %v441_v6, %v384_v5 }
  0x1d   :  { %309 = vmatpush.bf16.msra.mxu0 %v422_v16 }
  0x1e   :  { %240 = vmatpush.bf16.msra.mxu3 %v385_v7 }
  0x1f   :  { %185 = vmatpush.bf16.msra.mxu2 %v361_v25 }
  0x21   :  { %310 = vmatpush.bf16.msra.mxu0 %v418_v19 }
  0x23   :  { %186 = vmatpush.bf16.msra.mxu2 %v357_v28  ;;  %v410_v28 = vor.u32 %v447_v27, %v409_v26 }
  0x25   :  { %311 = vmatpush.bf16.msra.mxu0 %v414_v22 }
  0x27   :  { %187 = vmatpush.bf16.msra.mxu2 %v353_v31  ;;  %v406_v31 = vor.u32 %v446_v30, %v405_v29 }
  0x29   :  { %312 = vmatpush.bf16.msra.mxu0 %v410_v28 }
  0x2d   :  { %313 = vmatpush.bf16.msra.mxu0 %v406_v31 }
  0x89   :  { %v102_v32 = vpop.f32.mrf.mxu1 }
  0x8a   :  { %v119_v36 = vmax.f32 %v102_v32, 0.0  ;;  %v401_v32 = vld [vmem:[#allocation2 + $0xd0] sm:$0xf] }
  0x8c   :  { %v123_v40 = vmul.f32 %v121_v37, %v119_v36  ;;  %v516_v36 = vmov 16   ;;  %v204_v37 = vperm.slane %v551_v34, 5 }
  0x8d   :  { %459 = vset.pattern.permute.xlu0 %v516_v36 }
  0x8e   :  { %v127_v45 = vadd.f32 %v125_v42, %v123_v40  ;;  %v247_v40 = vperm.slane %v551_v34, 6  ;;  %v249_v42 = vperm.slane %v551_v34, 7 }
  0x91   :  { %v104_v33 = vpop.f32.mrf.mxu1 }
  0x92   :  { %v445_v33 = vld [vmem:[#allocation2 + $0xd4] sm:$0xf0] }
  0x93   :  { %v402_v35 = vor.u32 %v445_v33, %v401_v32 }
  0x95   :  { %314 = vmatpush.bf16.msra.mxu0 %v402_v35 }
  0x99   :  { %v115_v39 = vpop.f32.mrf.mxu1 }
  0x9a   :  { %v120_v41 = vmax.f32 %v115_v39, 0.0 }
  0x9c   :  { %v124_v44 = vmul.f32 %v122_v38, %v120_v41 }
  0x9e   :  { %v128_v46 = vadd.f32 %v126_v43, %v124_v44 }
  0xa0   :  { %v129_v47 = vmax.f32 %v127_v45, %v128_v46 }
  0xa1   :  { %v117_v48 = vpop.f32.mrf.mxu1 }
  0xa2   :  { %v130_v49 = vpack.c.bf16 %v129_v47, %v129_v47  ;;  %v36_v47 = vld [vmem:[%s572_s1 + $0x10] sm:$0xff] }
  0xa3   :  { %v257_v48 = vperm.slane %v36_v47, 1  ;;  %v320_v50 = vperm.slane %v36_v47, 0 }
  0xa4   :  { %188 = vmatmul.bf16.vlgmr.msra.gmra.mxu2 %v130_v49 }
 0x127   :  { %v189_v60 = vpop.f32.mrf.mxu2 }
 0x128   :  { %v190_v61 = vadd.f32 %v189_v60, %v131_v59 }
 0x12a   :  { %v193_v63 = vmax.f32 %v190_v61, 0.0 }
 0x12c   :  { %v195_v1 = vmul.f32 %v194_v62, %v193_v63 }
 0x12e   :  { %v197_v3 = vadd.f32 %v196_v0, %v195_v1 }
 0x12f   :  { %v191_v4 = vpop.f32.mrf.mxu2 }
 0x130   :  { %199 = vrot.lane.b32.xlu0 %v197_v3, %s515_s23 }
 0x138   :  { %254 = vperm.xlu0 %459, %v544_v2  }
 0x1a2   :  { %v200_v23 = vpop.permute.xlu0 %199 }
 0x1a3   :  { %v202_v24 = vmax.f32 %v197_v3, %v200_v23 }
 0x1a5   :  { %v203_v25 = vpack.c.bf16 %v202_v24, %v202_v24 }
 0x1a7   :  { %398 = vmatmul.msk.bf16.vlgmr.msra.gmra.mxu3 %vm229_vm1, %v203_v25 }
 0x1aa   :  { %v255_v2 = vpop.permute.xlu0 %254 }
 0x1ab   :  { %v258_v49 = vmul.f32 %v257_v48, %v255_v2 }
 0x22a   :  { %v242_v38 = vpop.f32.mrf.mxu3 }
 0x22b   :  { %v243_v39 = vadd.f32 %v242_v38, %v204_v37 }
 0x22d   :  { %v246_v41 = vmax.f32 %v243_v39, 0.0 }
 0x22f   :  { %v248_v43 = vmul.f32 %v247_v40, %v246_v41 }
 0x231   :  { %v250_v44 = vadd.f32 %v249_v42, %v248_v43 }
 0x232   :  { %v244_v45 = vpop.f32.mrf.mxu3 }
 0x233   :  { %v251_v46 = vpack.c.bf16 %v250_v44, %v250_v44 }
 0x235   :  { %315 = vmatmul.bf16.vlgmr.msra.gmra.mxu0 %v251_v46 }
 0x2b2   :  { %v316_v51 = vpop.f32.mrf.mxu0 }
 0x2b3   :  { %v317_v34 = vadd.f32 %v316_v51, %v258_v49 }
 0x2b5   :  { %v321_v52 = vadd.f32 %v320_v50, %v317_v34 }
 0x2b7   :  { %322 = vst [vmem:[#allocation5] sm:$0xff] %v321_v52 }
 0x2b8   :  { %333 = dma.vmem_to_hbm [thread:$0]  %s329_s27, 128, %s331_s30, [#allocation4]  }
 0x2ba   :  { %v318_v53 = vpop.f32.mrf.mxu0 }
 0x2bb   :  { %510 = dma.done.wait [#allocation4], 128  }
 0x2bc   :  { %511 = vsyncadd [#allocation4], 4294967168 }
 0x2bd   :  { %338 = vsyncpa [#allocation3], 1 }
 0x2be   :  { %339 = vsyncpa [#allocation4], 1 }

</bundles_post_ra>
